<compile_context>
chip_gen: v6e
topology: v6e:2x2x1
jax: 0.10.0
libtpu: 0.0.40
codegen_flags: <defaults>
</compile_context>

<pallas_src>
import functools

import jax
import jax.numpy as jnp
from jax import lax
from jax.experimental import pallas as pl
from jax.experimental.pallas import tpu as pltpu


def _make_convblock_kernel(win, dil, pad, b_tile, L, Cin, Cout, use_x):
    """Build the Pallas kernel body (all arguments are static)."""
    halo = (win - 1) * dil            # total left+right padding (== 2*pad)
    Lp = L + halo

    def kernel(x_ref, w_ref, b_ref, o_ref, xpad_s):
        # x_ref : (b_tile, Cin, L)     raw NCL input (also used as the residual)
        # w_ref : (2*Cout, win*Cin)    fused [conv1; conv2] im2col weights, f32
        # b_ref : (2*Cout, 1)          fused biases, f32
        # o_ref : (b_tile, Cout, L)    output, NCL, original input dtype
        # xpad_s: (Cin, Lp)            zero-padded activation scratch, f32

        # Zero only the halo columns, once per grid step; the body region is
        # overwritten per sequence below, the halos stay zero.
        if pad > 0:
            xpad_s[:, 0:pad] = jnp.zeros((Cin, pad), xpad_s.dtype)
            xpad_s[:, pad + L:Lp] = jnp.zeros((Cin, halo - pad), xpad_s.dtype)

        wmat = w_ref[...]                                  # (2*Cout, win*Cin)
        bias = b_ref[...]                                  # (2*Cout, 1)

        for b in range(b_tile):                            # static unroll
            xb = x_ref[b]                                  # (Cin, L)
            xpad_s[:, pad:pad + L] = xb.astype(xpad_s.dtype)

            # im2col as a register value: row k*Cin + ci <-> tap k, channel ci.
            xcol = jnp.concatenate(
                [xpad_s[:, k * dil:k * dil + L] for k in range(win)], axis=0)

            # One fused MXU matmul covers conv1 + conv2 over all taps.
            y = jnp.dot(wmat, xcol, preferred_element_type=jnp.float32)
            y = y + bias                                   # (2*Cout, L)

            x1 = y[:Cout, :]
            x2 = y[Cout:, :]
            out = x1 * jax.nn.sigmoid(x2)
            if use_x:
                out = out + xb.astype(jnp.float32)         # exact f32 residual
            o_ref[b] = out.astype(o_ref.dtype)

    return kernel


@functools.partial(jax.jit, static_argnames=("dil",))
def conv_block_pallas(x, w1, b1, w2, b2, *, dil=1):
    """x: [N, Cin, L] (PyTorch NCL). Returns [N, Cout, L]."""
    N, Cin, L = x.shape
    Cout, _, win = w1.shape
    if (dil * (win - 1)) % 2 != 0:
        # PyTorch's pad = dil*(win-1)//2 only gives 'same' length (and a
        # shape-compatible residual) when dil*(win-1) is even.
        raise NotImplementedError(
            "ConvBlock requires dil*(win-1) even for same-length Conv1d.")
    pad = dil * (win - 1) // 2
    use_x = Cin == Cout

    # Fold the (tiny) batch into as few grid steps as possible: whole batch
    # per step when N <= 8, else the largest divisor <= 8 per step.
    b_tile = next(b for b in range(min(N, 8), 0, -1) if N % b == 0)
    grid = (N // b_tile,)

    # Fused + im2col-flattened weights: rows = [conv1 outputs; conv2 outputs],
    # column index k*Cin + ci multiplies xpad[ci, l + k*dil].
    wf = jnp.concatenate([w1, w2], axis=0)                        # (2*Cout, Cin, win)
    wmat = jnp.transpose(wf, (0, 2, 1)).reshape(2 * Cout, win * Cin)
    wmat = wmat.astype(jnp.float32)
    bias = jnp.concatenate([b1, b2]).reshape(2 * Cout, 1).astype(jnp.float32)

    kernel = _make_convblock_kernel(win, dil, pad, b_tile, L, Cin, Cout, use_x)

    return pl.pallas_call(
        kernel,
        out_shape=jax.ShapeDtypeStruct((N, Cout, L), x.dtype),
        grid=grid,
        in_specs=[
            pl.BlockSpec((b_tile, Cin, L), lambda g: (g, 0, 0)),
            pl.BlockSpec((2 * Cout, win * Cin), lambda g: (0, 0)),   # resident
            pl.BlockSpec((2 * Cout, 1), lambda g: (0, 0)),           # resident
        ],
        out_specs=pl.BlockSpec((b_tile, Cout, L), lambda g: (g, 0, 0)),
        scratch_shapes=[
            pltpu.VMEM((Cin, L + (win - 1) * dil), jnp.float32),
        ],
        compiler_params=pltpu.CompilerParams(
            dimension_semantics=("parallel",),
            vmem_limit_bytes=32 * 1024 * 1024),
    )(x, wmat, bias)


def conv_block_ref(x, w1, b1, w2, b2, *, dil=1):
    """Pure-JAX f32 reference matching torch.nn.Conv1d semantics."""
    Cout, Cin, win = w1.shape
    pad = dil * (win - 1) // 2
    dn = ("NCH", "OIH", "NCH")

    def conv1d(x, w, b):
        y = lax.conv_general_dilated(
            x, w, window_strides=(1,), padding=[(pad, pad)],
            rhs_dilation=(dil,), dimension_numbers=dn)
        return y + b[None, :, None]

    x1 = conv1d(x, w1, b1)
    x2 = conv1d(x, w2, b2)
    out = x1 * jax.nn.sigmoid(x2)
    if x.shape[1] == Cout:
        out = out + x
    return out


if __name__ == "__main__":
    # Small shapes implied by the module: N=2, in_s=out_s=4, seq_len=16, win=3
    N, C_IN, C_OUT, L, WIN, DIL = 2, 4, 4, 16, 3, 1

    key = jax.random.PRNGKey(0)
    kx, kw1, kb1, kw2, kb2 = jax.random.split(key, 5)

    x = jax.random.normal(kx, (N, C_IN, L), dtype=jnp.float32)
    # Conv1d parameter shapes: weight [out, in, win], bias [out]
    w1 = jax.random.normal(kw1, (C_OUT, C_IN, WIN), dtype=jnp.float32) * 0.1
    b1 = jax.random.normal(kb1, (C_OUT,), dtype=jnp.float32) * 0.1
    w2 = jax.random.normal(kw2, (C_OUT, C_IN, WIN), dtype=jnp.float32) * 0.1
    b2 = jax.random.normal(kb2, (C_OUT,), dtype=jnp.float32) * 0.1

    out = conv_block_pallas(x, w1, b1, w2, b2, dil=DIL)
    out = jax.block_until_ready(out)

    ref = conv_block_ref(x, w1, b1, w2, b2, dil=DIL)
    assert out.shape == (N, C_OUT, L), out.shape
    # f32 data path; only the MXU matmul runs at default TPU precision.
    assert jnp.allclose(out, ref, atol=2e-2, rtol=2e-2), \
        float(jnp.max(jnp.abs(out - ref)))

    print("KERNEL_OK")
</pallas_src>

<mosaic_0001>
module attributes {stable_mosaic.version = 11 : i64} {
  func.func @kernel(%arg0: i32, %arg1: memref<2x4x16xf32, #tpu.memory_space<vmem>>, %arg2: memref<8x12xf32, #tpu.memory_space<vmem>>, %arg3: memref<8x1xf32, #tpu.memory_space<vmem>>, %arg4: memref<2x4x16xf32, #tpu.memory_space<vmem>>, %arg5: memref<4x18xf32, #tpu.memory_space<vmem>>) attributes {dimension_semantics = [#tpu.dimension_semantics<parallel>], iteration_bounds = array<i64: 1>, scalar_prefetch = 0 : i64, scratch_operands = 1 : i64, tpu.core_type = #tpu.core_type<tc>, window_params = [{transform_indices = @transform_0, window_bounds = array<i64: 2, 4, 16>}, {pipeline_mode = #tpu.pipeline_mode<synchronous>, transform_indices = @transform_1, window_bounds = array<i64: 8, 12>}, {pipeline_mode = #tpu.pipeline_mode<synchronous>, transform_indices = @transform_2, window_bounds = array<i64: 8, 1>}, {transform_indices = @transform_3, window_bounds = array<i64: 2, 4, 16>}]} {
    %cst = arith.constant 0.000000e+00 : f32
    %0 = vector.broadcast %cst : f32 to vector<4x1xf32>
    %c0 = arith.constant 0 : index
    %c0_0 = arith.constant 0 : index
    %1 = vector.load %arg5[%c0, %c0_0] : memref<4x18xf32, #tpu.memory_space<vmem>>, vector<4x1xf32>
    tpu.vector_store %arg5[%c0, %c0_0], %0 {strides = array<i32>} : memref<4x18xf32, #tpu.memory_space<vmem>>, vector<4x1xf32>,
    %cst_1 = arith.constant 0.000000e+00 : f32
    %2 = vector.broadcast %cst_1 : f32 to vector<4x1xf32>
    %c0_2 = arith.constant 0 : index
    %c17 = arith.constant 17 : index
    %3 = vector.load %arg5[%c0_2, %c17] : memref<4x18xf32, #tpu.memory_space<vmem>>, vector<4x1xf32>
    tpu.vector_store %arg5[%c0_2, %c17], %2 {strides = array<i32>} : memref<4x18xf32, #tpu.memory_space<vmem>>, vector<4x1xf32>,
    %c0_3 = arith.constant 0 : index
    %c0_4 = arith.constant 0 : index
    %4 = vector.load %arg2[%c0_3, %c0_4] : memref<8x12xf32, #tpu.memory_space<vmem>>, vector<8x12xf32>
    %c0_5 = arith.constant 0 : index
    %c0_6 = arith.constant 0 : index
    %5 = vector.load %arg3[%c0_5, %c0_6] : memref<8x1xf32, #tpu.memory_space<vmem>>, vector<8x1xf32>
    %c0_7 = arith.constant 0 : index
    %c0_8 = arith.constant 0 : index
    %c0_9 = arith.constant 0 : index
    %6 = vector.load %arg1[%c0_7, %c0_8, %c0_9] : memref<2x4x16xf32, #tpu.memory_space<vmem>>, vector<1x4x16xf32>
    %7 = vector.shape_cast %6 : vector<1x4x16xf32> to vector<4x16xf32>
    %c0_10 = arith.constant 0 : index
    %c1 = arith.constant 1 : index
    %8 = vector.load %arg5[%c0_10, %c1] : memref<4x18xf32, #tpu.memory_space<vmem>>, vector<4x16xf32>
    tpu.vector_store %arg5[%c0_10, %c1], %7 {strides = array<i32>} : memref<4x18xf32, #tpu.memory_space<vmem>>, vector<4x16xf32>,
    %c0_11 = arith.constant 0 : index
    %c0_12 = arith.constant 0 : index
    %9 = vector.load %arg5[%c0_11, %c0_12] : memref<4x18xf32, #tpu.memory_space<vmem>>, vector<4x16xf32>
    %c0_13 = arith.constant 0 : index
    %c1_14 = arith.constant 1 : index
    %10 = vector.load %arg5[%c0_13, %c1_14] : memref<4x18xf32, #tpu.memory_space<vmem>>, vector<4x16xf32>
    %c0_15 = arith.constant 0 : index
    %c2 = arith.constant 2 : index
    %11 = vector.load %arg5[%c0_15, %c2] : memref<4x18xf32, #tpu.memory_space<vmem>>, vector<4x16xf32>
    %12 = tpu.concatenate %9, %10, %11 in 0 : vector<4x16xf32>, vector<4x16xf32>, vector<4x16xf32> -> vector<12x16xf32>
    %cst_16 = arith.constant dense<0.000000e+00> : vector<8x16xf32>
    %13 = tpu.matmul %4, %12, %cst_16 {dimension_numbers = #tpu.dot_dimension_numbers<[1], [0], [0], [1], [0, 0, 1, 1], [], []>} : vector<8x12xf32>, vector<12x16xf32>, vector<8x16xf32> -> vector<8x16xf32>
    %14 = vector.broadcast %5 : vector<8x1xf32> to vector<8x16xf32>
    %15 = arith.addf %13, %14 : vector<8x16xf32>
    %16 = vector.extract_strided_slice %15 {offsets = [0, 0], sizes = [4, 16], strides = [1, 1]} : vector<8x16xf32> to vector<4x16xf32>
    %17 = vector.extract_strided_slice %15 {offsets = [4, 0], sizes = [4, 16], strides = [1, 1]} : vector<8x16xf32> to vector<4x16xf32>
    %18 = arith.negf %17 : vector<4x16xf32>
    %19 = math.exp %18 : vector<4x16xf32>
    %cst_17 = arith.constant 1.000000e+00 : f32
    %20 = vector.broadcast %cst_17 : f32 to vector<4x16xf32>
    %21 = arith.addf %20, %19 : vector<4x16xf32>
    %22 = arith.divf %20, %21 : vector<4x16xf32>
    %23 = arith.mulf %16, %22 : vector<4x16xf32>
    %24 = arith.addf %23, %7 : vector<4x16xf32>
    %c0_18 = arith.constant 0 : index
    %c0_19 = arith.constant 0 : index
    %c0_20 = arith.constant 0 : index
    %25 = vector.load %arg4[%c0_18, %c0_19, %c0_20] : memref<2x4x16xf32, #tpu.memory_space<vmem>>, vector<1x4x16xf32>
    %26 = vector.shape_cast %25 : vector<1x4x16xf32> to vector<4x16xf32>
    %27 = vector.shape_cast %24 : vector<4x16xf32> to vector<1x4x16xf32>
    tpu.vector_store %arg4[%c0_18, %c0_19, %c0_20], %27 {strides = array<i32>} : memref<2x4x16xf32, #tpu.memory_space<vmem>>, vector<1x4x16xf32>,
    %c1_21 = arith.constant 1 : index
    %c0_22 = arith.constant 0 : index
    %c0_23 = arith.constant 0 : index
    %28 = vector.load %arg1[%c1_21, %c0_22, %c0_23] : memref<2x4x16xf32, #tpu.memory_space<vmem>>, vector<1x4x16xf32>
    %29 = vector.shape_cast %28 : vector<1x4x16xf32> to vector<4x16xf32>
    %c0_24 = arith.constant 0 : index
    %c1_25 = arith.constant 1 : index
    %30 = vector.load %arg5[%c0_24, %c1_25] : memref<4x18xf32, #tpu.memory_space<vmem>>, vector<4x16xf32>
    tpu.vector_store %arg5[%c0_24, %c1_25], %29 {strides = array<i32>} : memref<4x18xf32, #tpu.memory_space<vmem>>, vector<4x16xf32>,
    %c0_26 = arith.constant 0 : index
    %c0_27 = arith.constant 0 : index
    %31 = vector.load %arg5[%c0_26, %c0_27] : memref<4x18xf32, #tpu.memory_space<vmem>>, vector<4x16xf32>
    %c0_28 = arith.constant 0 : index
    %c1_29 = arith.constant 1 : index
    %32 = vector.load %arg5[%c0_28, %c1_29] : memref<4x18xf32, #tpu.memory_space<vmem>>, vector<4x16xf32>
    %c0_30 = arith.constant 0 : index
    %c2_31 = arith.constant 2 : index
    %33 = vector.load %arg5[%c0_30, %c2_31] : memref<4x18xf32, #tpu.memory_space<vmem>>, vector<4x16xf32>
    %34 = tpu.concatenate %31, %32, %33 in 0 : vector<4x16xf32>, vector<4x16xf32>, vector<4x16xf32> -> vector<12x16xf32>
    %cst_32 = arith.constant dense<0.000000e+00> : vector<8x16xf32>
    %35 = tpu.matmul %4, %34, %cst_32 {dimension_numbers = #tpu.dot_dimension_numbers<[1], [0], [0], [1], [0, 0, 1, 1], [], []>} : vector<8x12xf32>, vector<12x16xf32>, vector<8x16xf32> -> vector<8x16xf32>
    %36 = vector.broadcast %5 : vector<8x1xf32> to vector<8x16xf32>
    %37 = arith.addf %35, %36 : vector<8x16xf32>
    %38 = vector.extract_strided_slice %37 {offsets = [0, 0], sizes = [4, 16], strides = [1, 1]} : vector<8x16xf32> to vector<4x16xf32>
    %39 = vector.extract_strided_slice %37 {offsets = [4, 0], sizes = [4, 16], strides = [1, 1]} : vector<8x16xf32> to vector<4x16xf32>
    %40 = arith.negf %39 : vector<4x16xf32>
    %41 = math.exp %40 : vector<4x16xf32>
    %cst_33 = arith.constant 1.000000e+00 : f32
    %42 = vector.broadcast %cst_33 : f32 to vector<4x16xf32>
    %43 = arith.addf %42, %41 : vector<4x16xf32>
    %44 = arith.divf %42, %43 : vector<4x16xf32>
    %45 = arith.mulf %38, %44 : vector<4x16xf32>
    %46 = arith.addf %45, %29 : vector<4x16xf32>
    %c1_34 = arith.constant 1 : index
    %c0_35 = arith.constant 0 : index
    %c0_36 = arith.constant 0 : index
    %47 = vector.load %arg4[%c1_34, %c0_35, %c0_36] : memref<2x4x16xf32, #tpu.memory_space<vmem>>, vector<1x4x16xf32>
    %48 = vector.shape_cast %47 : vector<1x4x16xf32> to vector<4x16xf32>
    %49 = vector.shape_cast %46 : vector<4x16xf32> to vector<1x4x16xf32>
    tpu.vector_store %arg4[%c1_34, %c0_35, %c0_36], %49 {strides = array<i32>} : memref<2x4x16xf32, #tpu.memory_space<vmem>>, vector<1x4x16xf32>,
    return
  }
  func.func @transform_0(%arg0: i32) -> (i32, i32, i32) {
    %c0_i32 = arith.constant 0 : i32
    %c0_i32_0 = arith.constant 0 : i32
    %c0_i32_1 = arith.constant 0 : i32
    return %arg0, %c0_i32, %c0_i32_0 : i32, i32, i32
  }
  func.func @transform_1(%arg0: i32) -> (i32, i32) {
    %c0_i32 = arith.constant 0 : i32
    %c0_i32_0 = arith.constant 0 : i32
    %c0_i32_1 = arith.constant 0 : i32
    return %c0_i32, %c0_i32_0 : i32, i32
  }
  func.func @transform_2(%arg0: i32) -> (i32, i32) {
    %c0_i32 = arith.constant 0 : i32
    %c0_i32_0 = arith.constant 0 : i32
    %c0_i32_1 = arith.constant 0 : i32
    return %c0_i32, %c0_i32_0 : i32, i32
  }
  func.func @transform_3(%arg0: i32) -> (i32, i32, i32) {
    %c0_i32 = arith.constant 0 : i32
    %c0_i32_0 = arith.constant 0 : i32
    %c0_i32_1 = arith.constant 0 : i32
    return %arg0, %c0_i32, %c0_i32_0 : i32, i32, i32
  }
}

</mosaic_0001>

<bundles_post_ra>
// kernel: conv_block_pallas.1
= control target key start
LH: loop header
LB: loop body
LE: loop exit
PB: predicated region body
PF: predicated region fallthrough
CT: control target
= control target key end

     0   :  { %s316_s14 = smov 1   ;;  %vm15_vm0 = vcmask 3072   ;;  %vm17_vm1 = vcmask 142472   ;;  %v317_v2 = vmov 0.0   ;;  %s368_s0 = inlined_call_operand.vmem [shape: f32[2,4,16], index: 0, kind: input, shape index: {}]   ;;  %s369_s1 = inlined_call_operand.vmem [shape: f32[8,12], index: 1, kind: input, shape index: {}]   ;;  %s370_s2 = inlined_call_operand.vmem [shape: f32[8,1], index: 2, kind: input, shape index: {}]   ;;  %s371_s3 = inlined_call_operand.hbm [shape: f32[2,4,16], index: 3, kind: output, shape index: {}]  }
   0x1   :  { %v348_v0 = vld [vmem:[%s368_s0] sm:$0xf]  ;;  %v354_v1 = vld [vmem:[%s368_s0 + $0x4] sm:$0xf]  ;;  %16 = vst.msk [vmem:[#allocation2] sm:$0xf] %vm15_vm0, %v317_v2  ;;  %262 = vmatprep.subr.mxu0 %v317_v2  ;;  %269 = vmatprep.subr.mxu1 %v317_v2 }
   0x2   :  { %23 = vrot.lane.b32.xlu0 %v348_v0, %s316_s14 }
   0x3   :  { %8 = vsyncpa [#allocation4], 0  ;;  %18 = vst.msk [vmem:[#allocation2] sm:$0xf] %vm17_vm1, %v317_v2  ;;  %vm26_vm2 = vcmask 134152   ;;  %vm318_vm3 = vmmov 0  }
   0x4   :  { %266 = vmatprep.mubr.msk.f32.mxu0 %vm318_vm3, %v317_v2  ;;  %273 = vmatprep.mubr.msk.f32.mxu1 %vm318_vm3, %v317_v2  ;;  %s319_s17 = smov 126   ;;  %s320_s0 = smov 127   ;;  %v321_v7 = vmov 0   ;;  %v20_v8 = vld [vmem:[%s370_s2] sm:$0xff]  ;;  %vm36_vm4 = vcmask 1043456   ;;  %vm43_vm5 = vcmask 97280  }
   0x5   :  { %285 = vset.pattern.permute.xlu0 %v321_v7  ;;  %v19_v13 = vld [vmem:[%s369_s1] sm:$0xff]  ;;  %vm130_vm6 = vcmask 125952   ;;  %s322_s1 = smov [#allocation3]  }
   0x6   :  { %135 = vrot.lane.b32.xlu0 %v354_v1, %s316_s14  ;;  %s238_s2 = sshll.u32 %s322_s1, 4  ;;  %s239_s2 = int_to_ptr.vmem [resolvable:$true] %s238_s2 }
   0x7   :  { %s294_s22 = scalar_lea.vmem %s239_s2, 128  ;;  %p299_p1 = scmp.lt.s32.totalorder %s239_s2, %s239_s2 }
   0x8   :  { %p295_p0 = scmp.ne.s32.totalorder %s239_s2, %s294_s22  ;;  %p300_p2 = scmp.lt.s32.totalorder %s294_s22, %s294_s22 }
   0xa   :  { %p301_p3 = por %p300_p2, %p299_p1 }
   0xc   :  { %p302_p4 = pnand %p301_p3, %p295_p0 }
  0x74   :  { %v24_v3 = vpop.permute.xlu0 %23 }
  0x75   :  { %27 = vst.msk [vmem:[#allocation2] sm:$0xf] %vm26_vm2, %v24_v3 }
  0x78   :  { %v136_v4 = vpop.permute.xlu0 %135 }
  0x7c   :  { %v28_v5 = vld [vmem:[#allocation2] sm:$0xf] }
  0x7d   :  { %138 = vst.msk [vmem:[#allocation2] sm:$0xf] %vm26_vm2, %v136_v4  ;;  %34 = vrot.lane.b32.xlu1 %v28_v5, %s319_s17  ;;  %v30_v6 = vrot.slane %v28_v5, 4 }
  0x7f   :  { %31 = vrot.lane.b32.xlu0 %v30_v6, %s320_s0 }
  0x83   :  { %40 = vperm.xlu0 %285, %v20_v8  }
  0x84   :  { %v139_v9 = vld [vmem:[#allocation2] sm:$0xf] }
  0x85   :  { %145 = vrot.lane.b32.xlu1 %v139_v9, %s319_s17  ;;  %v141_v10 = vrot.slane %v139_v9, 4 }
  0x89   :  { %142 = vrot.lane.b32.xlu1 %v141_v10, %s320_s0 }
  0xef   :  { %v35_v11 = vpop.permute.xlu1 %34 }
  0xf0   :  { %263 = vmatpush3.msk.msra.mxu0 %vm36_vm4, %v35_v11 }
  0xf1   :  { %v32_v12 = vpop.permute.xlu0 %31  ;;  %264 = vmatprep.subr.mxu0 %v317_v2 }
  0xf2   :  { %v37_v14 = vsel %vm36_vm4, %v28_v5, %v32_v12 }
  0xf3   :  { %265 = vmatpush3.msra.mxu0 %v37_v14 }
  0xf4   :  { %267 = vmatmul.mubr.msk.f32.vlgmr.msra.gmra.mxu0 %vm43_vm5, %v19_v13 }
  0xf7   :  { %v146_v15 = vpop.permute.xlu1 %145 }
  0xf8   :  { %270 = vmatpush3.msk.msra.mxu1 %vm36_vm4, %v146_v15 }
  0xf9   :  { %271 = vmatprep.subr.mxu1 %v317_v2 }
  0xfb   :  { %v143_v16 = vpop.permute.xlu1 %142 }
  0xfc   :  { %v147_v17 = vsel %vm36_vm4, %v139_v9, %v143_v16 }
  0xfd   :  { %272 = vmatpush3.msra.mxu1 %v147_v17 }
  0xfe   :  { %274 = vmatmul.mubr.msk.f32.vlgmr.msra.gmra.mxu1 %vm43_vm5, %v19_v13  ;;  %v41_v18 = vpop.permute.xlu0 %40 }
 0x1b4   :  { %v115_v19 = vpop.f32.mrf.mxu0 }
 0x1b5   :  { %v116_v20 = vadd.f32 %v115_v19, %v41_v18 }
 0x1b6   :  { %v268_v21 = vpop.f32.mrf.mxu0 }
 0x1b7   :  { %v251_v22 = vmul.f32 -1.442695, %v116_v20 }
 0x1b9   :  { %286 = vpow2.f32 %v251_v22 }
 0x1be   :  { %v216_v23 = vpop.f32.mrf.mxu1 }
 0x1bf   :  { %v217_v24 = vadd.f32 %v216_v23, %v41_v18 }
 0x1c0   :  { %v275_v25 = vpop.f32.mrf.mxu1 }
 0x1c1   :  { %v255_v26 = vmul.f32 -1.442695, %v217_v24 }
 0x1c3   :  { %288 = vpow2.f32 %v255_v26 }
 0x1c6   :  { %v287_v27 = vpop.eup %286 }
 0x1c7   :  { %v122_v28 = vadd.f32 1.0, %v287_v27 }
 0x1c9   :  { %290 = vrcp.f32 %v122_v28 }
 0x1d0   :  { %v289_v29 = vpop.eup %288 }
 0x1d1   :  { %v223_v30 = vadd.f32 1.0, %v289_v29 }
 0x1d3   :  { %292 = vrcp.f32 %v223_v30 }
 0x1d6   :  { %v291_v31 = vpop.eup %290 }
 0x1d7   :  { %v126_v32 = vrot.slane %v291_v31, 4 }
 0x1d9   :  { %v128_v33 = vmul.f32 %v126_v32, %v116_v20 }
 0x1db   :  { %v129_v34 = vadd.f32 %v128_v33, %v348_v0 }
 0x1dd   :  { %131 = vst.msk [vmem:[#allocation3] sm:$0xf] %vm130_vm6, %v129_v34 }
 0x1e0   :  { %v293_v35 = vpop.eup %292 }
 0x1e1   :  { %v227_v36 = vrot.slane %v293_v35, 4 }
 0x1e3   :  { %v229_v37 = vmul.f32 %v227_v36, %v217_v24 }
 0x1e5   :  { %v230_v38 = vadd.f32 %v354_v1, %v229_v37 }
 0x1e7   :  { %232 = vst.msk [vmem:[#allocation3 + $0x4] sm:$0xf] %vm130_vm6, %v230_v38 }
 0x1e8   :  { %305 = shalt.err (!%p302_p4)
}
 0x1e9   :  { %s323_s23 = smov 64   ;;  %s324_s24 = smov 4  }
 0x1ea   :  { %244 = dma.vmem_to_hbm [thread:$0]  %s239_s2, 128, %s371_s3, [#allocation4], %s323_s23, %s323_s23, %s324_s24  }
 0x1eb   :  { %314 = dma.done.wait [#allocation4], 128  }
 0x1ec   :  { %315 = vsyncadd [#allocation4], 4294967168 }
 0x1ed   :  { %248 = vsyncpa [#allocation4], 1 }

</bundles_post_ra>
